<compile_context>
chip_gen: v6e
topology: v6e:2x2x1
jax: 0.10.0
libtpu: 0.0.40
codegen_flags: <defaults>
</compile_context>

<pallas_src>
import functools

import numpy as np
import jax
import jax.numpy as jnp
from jax.experimental import pallas as pl
from jax.experimental.pallas import tpu as pltpu


def _round_up(x, m):
    return (x + m - 1) // m * m


# ---------------------------------------------------------------------------
# Kernel body (shared by both layouts)
# ---------------------------------------------------------------------------
def _maxpool_kernel(x_ref, out_ref, idx_ref, *, pool_factor, l_out, lane_strided):
    """Max + argmax over pooling windows.

    lane_strided=False: x_ref is (pool_factor, TR, W); window offset j is x_ref[j].
    lane_strided=True : x_ref is (TR, W*pool_factor); window offset j is the lane-strided
                        slice x_ref[:, j::pool_factor].
    out_ref / idx_ref: (TR, W), W a multiple of l_out (row folding).
    """
    w = out_ref.shape[-1]

    def window(j):
        if lane_strided:
            return x_ref[:, pl.ds(j, w, stride=pool_factor)]
        return x_ref[j]

    best = window(0)
    best_off = jnp.zeros(best.shape, dtype=jnp.int32)
    is_float = jnp.issubdtype(x_ref.dtype, jnp.floating)
    for j in range(1, pool_factor):
        cand = window(j)
        take = cand > best                       # strict '>' keeps the first max on ties
        if is_float:                             # first-NaN-wins; NaN propagates (torch behaviour)
            take = jnp.logical_or(
                take,
                jnp.logical_and(jnp.isnan(cand), jnp.logical_not(jnp.isnan(best))))
        best = jnp.where(take, cand, best)
        best_off = jnp.where(take, jnp.int32(j), best_off)

    # absolute index = window_start + offset, computed once per (1, W) row and broadcast
    lane = jax.lax.broadcasted_iota(jnp.int32, (1, w), 1)
    if (l_out & (l_out - 1)) == 0:
        pos = lane & jnp.int32(l_out - 1)
    else:
        pos = lane % jnp.int32(l_out)
    out_ref[...] = best
    idx_ref[...] = best_off + pos * jnp.int32(pool_factor)


# ---------------------------------------------------------------------------
# Device / capability helpers
# ---------------------------------------------------------------------------
@functools.cache
def _device_kind():
    try:
        return jax.devices()[0].device_kind.lower()
    except Exception:
        return ""


def _is_v7():
    kind = _device_kind()
    return ("v7" in kind) or ("tpu7" in kind)


@functools.cache
def _core_parallel_ok():
    """CORE_PARALLEL on the row-tile axis (only attempted on v7x: 2 TensorCores per chip)."""
    if not _is_v7():
        return False
    try:
        with jax.ensure_compile_time_eval():
            def k(x_ref, o_ref):
                o_ref[...] = x_ref[...] + 1.0
            x = jnp.zeros((16, 128), jnp.float32)
            y = pl.pallas_call(
                k,
                out_shape=jax.ShapeDtypeStruct((16, 128), jnp.float32),
                grid=(2,),
                in_specs=[pl.BlockSpec((8, 128), lambda i: (i, 0))],
                out_specs=pl.BlockSpec((8, 128), lambda i: (i, 0)),
                compiler_params=pltpu.CompilerParams(
                    dimension_semantics=(pltpu.CORE_PARALLEL,)),
            )(x)
            return bool(jnp.all(y == 1.0))
    except Exception:
        return False


@functools.cache
def _lane_strided_ok(pool_factor, w, l_out, dtype_str):
    """Probe: does Mosaic lower lane-strided slices x_ref[:, pl.ds(j, w, stride=pf)] correctly?"""
    if pool_factor == 1:
        return True
    try:
        with jax.ensure_compile_time_eval():
            dtype = jnp.dtype(dtype_str)
            tr = 8
            x_np = np.random.RandomState(0).standard_normal((tr, w * pool_factor)).astype(dtype)
            out, idx = pl.pallas_call(
                functools.partial(_maxpool_kernel, pool_factor=pool_factor, l_out=l_out,
                                  lane_strided=True),
                out_shape=(jax.ShapeDtypeStruct((tr, w), dtype),
                           jax.ShapeDtypeStruct((tr, w), jnp.int32)),
                grid=(1,),
                in_specs=[pl.BlockSpec((tr, w * pool_factor), lambda i: (i, 0))],
                out_specs=(pl.BlockSpec((tr, w), lambda i: (i, 0)),
                           pl.BlockSpec((tr, w), lambda i: (i, 0))),
            )(jnp.asarray(x_np))
            xr = np.asarray(x_np, np.float64).reshape(tr, w, pool_factor)
            ref_out = xr.max(-1).astype(dtype)
            ref_idx = (xr.argmax(-1)
                       + (np.arange(w) % l_out)[None, :] * pool_factor).astype(np.int32)
            return (np.array_equal(np.asarray(out), ref_out)
                    and np.array_equal(np.asarray(idx), ref_idx))
    except Exception:
        return False


def _tile_rows(pool_factor, w, itemsize, n_rows):
    """Row-tile size + VMEM limit, generation-aware."""
    row_align = max(8, 32 // max(1, itemsize))          # 8 (4B), 16 (2B), 32 (1B) sublane packing
    # VMEM bytes per folded row, per pipeline buffer: input slab + value out + int32 index out
    per_row = pool_factor * w * itemsize + w * (itemsize + 4)
    budget = (5 << 20) if _is_v7() else (12 << 20)      # v7x: 64 MiB/TC; v5e/v6e: 128 MiB VMEM
    tr = max(row_align, (budget // per_row) // row_align * row_align)
    tr = min(tr, _round_up(n_rows, row_align))
    vmem_limit = 2 * tr * per_row + (16 << 20)          # double-buffered blocks + headroom
    vmem_limit = int(min(max(vmem_limit, 32 << 20), (56 << 20) if _is_v7() else (100 << 20)))
    return tr, vmem_limit


# ---------------------------------------------------------------------------
# Public wrapper
# ---------------------------------------------------------------------------
def pool_in_dim(x, dimension, input_size):
    """JAX/Pallas equivalent of PoolInDim.forward.  Returns (values, indices[int32])."""
    ndim = x.ndim
    d = dimension % ndim
    assert input_size >= 64, "input_size must be >= 64 (pool_factor would be 0)"
    assert x.shape[d] == input_size, (x.shape, d, input_size)
    pool_factor = int(input_size // 64)
    l_out = input_size // pool_factor

    perm = list(range(ndim))
    perm[d], perm[-1] = perm[-1], perm[d]               # self-inverse swap
    lead_axes = perm[:-1]                               # non-pooled axes, permuted order
    lead_shape = tuple(x.shape[a] for a in lead_axes)
    n_rows = int(np.prod(lead_shape)) if lead_shape else 1

    # MaxPool1d drops the tail when L is not a multiple of pool_factor
    if input_size % pool_factor != 0:
        x = jax.lax.slice_in_dim(x, 0, l_out * pool_factor, axis=d)
    L = l_out * pool_factor

    # lane-dense fold along the flattened row axis (pure contiguous reshape -> free)
    # TODO(synk): pad one row when n_rows is odd so the fold always reaches 128 lanes.
    fold = 1
    while (l_out * fold < 128) and (n_rows % (2 * fold) == 0):
        fold *= 2
    r2 = n_rows // fold
    w = l_out * fold

    itemsize = jnp.dtype(x.dtype).itemsize
    tr, vmem_limit = _tile_rows(pool_factor, w, itemsize, r2)
    grid = (pl.cdiv(r2, tr),)

    dim_sem = (pltpu.CORE_PARALLEL,) if _core_parallel_ok() else ("parallel",)
    cparams = pltpu.CompilerParams(dimension_semantics=dim_sem,
                                   vmem_limit_bytes=vmem_limit)
    out_shapes = (jax.ShapeDtypeStruct((r2, w), x.dtype),
                  jax.ShapeDtypeStruct((r2, w), jnp.int32))
    out_specs = (pl.BlockSpec((tr, w), lambda i: (i, 0)),
                 pl.BlockSpec((tr, w), lambda i: (i, 0)))

    use_fast = (d == ndim - 1) and _lane_strided_ok(
        pool_factor, w, l_out, str(jnp.dtype(x.dtype)))

    if use_fast:
        # d == last: zero HBM transposes.  Contiguous (r2, fold*L) lane-dense blocks straight
        # from the original layout; window offsets taken in-kernel with lane-strided slices.
        x2 = x.reshape(r2, fold * L)                    # free (contiguous) reshape
        out2, idx2 = pl.pallas_call(
            functools.partial(_maxpool_kernel, pool_factor=pool_factor, l_out=l_out,
                              lane_strided=True),
            out_shape=out_shapes,
            grid=grid,
            in_specs=[pl.BlockSpec((tr, fold * L), lambda i: (i, 0))],
            out_specs=out_specs,
            compiler_params=cparams,
        )(x2)
    else:
        # general case: ONE relayout to (pool_factor, r2, w) so each window offset is a clean
        # contiguous slab; every other reshape (splits / merges / fold) is free.
        # TODO(synk): for d != last this transpose is still an extra HBM pass; expressing the
        # lead-axis permutation through the BlockSpec index_map plus an in-VMEM minor-dim shuffle
        # (pltpu.einshape) would remove it, but needs lane-gather support not probed here.
        new_shape, axis_map = [], {}
        for a in range(ndim):
            start = len(new_shape)
            new_shape += [l_out, pool_factor] if a == d else [x.shape[a]]
            axis_map[a] = list(range(start, len(new_shape)))
        xs = x.reshape(new_shape)
        order = [axis_map[d][1]] + [axis_map[a][0] for a in lead_axes] + [axis_map[d][0]]
        x3 = jnp.transpose(xs, order).reshape(pool_factor, r2, w)
        out2, idx2 = pl.pallas_call(
            functools.partial(_maxpool_kernel, pool_factor=pool_factor, l_out=l_out,
                              lane_strided=False),
            out_shape=out_shapes,
            grid=grid,
            in_specs=[pl.BlockSpec((pool_factor, tr, w), lambda i: (0, i, 0))],
            out_specs=out_specs,
            compiler_params=cparams,
        )(x3)

    out_p = out2.reshape(*lead_shape, l_out)            # pooled values, permuted layout (free)
    indices = idx2.reshape(*lead_shape, l_out)          # torch keeps indices un-permuted-back
    out = out_p if d == ndim - 1 else jnp.swapaxes(out_p, d, -1)
    # TODO(synk): torch returns int64 indices; JAX x64 is off by default, so int32 is returned.
    return out, indices


# ---------------------------------------------------------------------------
# Pure-numpy reference mirroring the PyTorch semantics
# ---------------------------------------------------------------------------
def _reference(x, dimension, input_size):
    pool_factor = int(input_size // 64)
    xn = np.asarray(x)
    d = dimension % xn.ndim
    perm = list(range(xn.ndim))
    perm[d], perm[-1] = perm[-1], perm[d]
    xp = np.transpose(xn, perm)
    lead = xp.shape[:-1]
    l_out = xp.shape[-1] // pool_factor
    win = xp[..., : l_out * pool_factor].reshape(*lead, l_out, pool_factor)
    out_p = win.max(axis=-1)
    idx = (win.argmax(axis=-1)
           + (np.arange(l_out) * pool_factor).reshape((1,) * len(lead) + (l_out,)))
    return np.transpose(out_p, perm), idx.astype(np.int32)


if __name__ == "__main__":
    fwd = jax.jit(pool_in_dim, static_argnums=(1, 2))
    input_size = 128                                    # pool_factor = 2, l_out = 64
    key = jax.random.PRNGKey(0)
    k1, k2, k3, k4 = jax.random.split(key, 4)

    # 1) pooled dim in the middle (relayout path): x (2, 128, 8), dimension=1
    x1 = jax.random.normal(k1, (2, input_size, 8), jnp.float32)
    out1, idx1 = jax.block_until_ready(fwd(x1, 1, input_size))
    r_out, r_idx = _reference(x1, 1, input_size)
    assert out1.shape == (2, 64, 8) and idx1.shape == (2, 8, 64)
    np.testing.assert_allclose(np.asarray(out1), r_out, rtol=1e-6, atol=1e-6)
    np.testing.assert_array_equal(np.asarray(idx1), r_idx)

    # 2) pooled dim last (transpose-free fast path when lane-strided loads are supported)
    x2 = jax.random.normal(k2, (2, 8, input_size), jnp.float32)
    out2, idx2 = jax.block_until_ready(fwd(x2, 2, input_size))
    r_out, r_idx = _reference(x2, 2, input_size)
    np.testing.assert_allclose(np.asarray(out2), r_out, rtol=1e-6, atol=1e-6)
    np.testing.assert_array_equal(np.asarray(idx2), r_idx)

    # 3) odd row count (no fold -> narrow-store fallback)
    x3 = jax.random.normal(k3, (3, input_size, 7), jnp.float32)
    out3, idx3 = jax.block_until_ready(fwd(x3, 1, input_size))
    r_out, r_idx = _reference(x3, 1, input_size)
    np.testing.assert_allclose(np.asarray(out3), r_out, rtol=1e-6, atol=1e-6)
    np.testing.assert_array_equal(np.asarray(idx3), r_idx)

    # 4) NaN propagation + first-NaN index selection
    x4 = jax.random.normal(k4, (2, 4, input_size), jnp.float32)
    x4 = x4.at[0, 1, 2].set(jnp.nan).at[0, 1, 3].set(jnp.nan).at[1, 2, 100].set(jnp.nan)
    out4, idx4 = jax.block_until_ready(fwd(x4, 2, input_size))
    r_out, r_idx = _reference(x4, 2, input_size)
    np.testing.assert_allclose(np.asarray(out4), r_out, rtol=1e-6, atol=1e-6, equal_nan=True)
    np.testing.assert_array_equal(np.asarray(idx4), r_idx)

    print("KERNEL_OK")
</pallas_src>

<mosaic_0001>
module attributes {stable_mosaic.version = 11 : i64} {
  func.func @_maxpool_kernel(%arg0: i32, %arg1: memref<2x8x128xf32, #tpu.memory_space<vmem>>, %arg2: memref<8x128xf32, #tpu.memory_space<vmem>>, %arg3: memref<8x128xi32, #tpu.memory_space<vmem>>) attributes {dimension_semantics = [#tpu.dimension_semantics<parallel>], iteration_bounds = array<i64: 1>, scalar_prefetch = 0 : i64, scratch_operands = 0 : i64, tpu.core_type = #tpu.core_type<tc>, window_params = [{transform_indices = @transform_0, window_bounds = array<i64: 2, 8, 128>}, {transform_indices = @transform_1, window_bounds = array<i64: 8, 128>}, {transform_indices = @transform_2, window_bounds = array<i64: 8, 128>}]} {
    %c0 = arith.constant 0 : index
    %c0_0 = arith.constant 0 : index
    %c0_1 = arith.constant 0 : index
    %0 = vector.load %arg1[%c0, %c0_0, %c0_1] : memref<2x8x128xf32, #tpu.memory_space<vmem>>, vector<1x8x128xf32>
    %1 = vector.shape_cast %0 : vector<1x8x128xf32> to vector<8x128xf32>
    %c0_i32 = arith.constant 0 : i32
    %2 = vector.broadcast %c0_i32 : i32 to vector<8x128xi32>
    %c1 = arith.constant 1 : index
    %c0_2 = arith.constant 0 : index
    %c0_3 = arith.constant 0 : index
    %3 = vector.load %arg1[%c1, %c0_2, %c0_3] : memref<2x8x128xf32, #tpu.memory_space<vmem>>, vector<1x8x128xf32>
    %4 = vector.shape_cast %3 : vector<1x8x128xf32> to vector<8x128xf32>
    %5 = arith.cmpf ogt, %4, %1 : vector<8x128xf32>
    %6 = arith.cmpf one, %4, %4 : vector<8x128xf32>
    %7 = arith.cmpf one, %1, %1 : vector<8x128xf32>
    %cst = arith.constant dense<true> : vector<8x128xi1>
    %8 = arith.xori %7, %cst : vector<8x128xi1>
    %9 = arith.andi %6, %8 : vector<8x128xi1>
    %10 = arith.ori %5, %9 : vector<8x128xi1>
    %11 = arith.select %10, %4, %1 : vector<8x128xi1>, vector<8x128xf32>
    %c1_i32 = arith.constant 1 : i32
    %12 = vector.broadcast %c1_i32 : i32 to vector<8x128xi32>
    %13 = arith.select %10, %12, %2 : vector<8x128xi1>, vector<8x128xi32>
    %14 = tpu.iota {dimensions = array<i32: 1>} : vector<1x128xi32>
    %c63_i32 = arith.constant 63 : i32
    %15 = vector.broadcast %c63_i32 : i32 to vector<1x128xi32>
    %16 = arith.andi %14, %15 : vector<1x128xi32>
    %c0_4 = arith.constant 0 : index
    %c0_5 = arith.constant 0 : index
    %17 = vector.load %arg2[%c0_4, %c0_5] : memref<8x128xf32, #tpu.memory_space<vmem>>, vector<8x128xf32>
    tpu.vector_store %arg2[%c0_4, %c0_5], %11 {strides = array<i32>} : memref<8x128xf32, #tpu.memory_space<vmem>>, vector<8x128xf32>,
    %c2_i32 = arith.constant 2 : i32
    %18 = vector.broadcast %c2_i32 : i32 to vector<1x128xi32>
    %19 = arith.muli %16, %18 : vector<1x128xi32>
    %20 = vector.broadcast %19 : vector<1x128xi32> to vector<8x128xi32>
    %21 = arith.addi %13, %20 : vector<8x128xi32>
    %c0_6 = arith.constant 0 : index
    %c0_7 = arith.constant 0 : index
    %22 = vector.load %arg3[%c0_6, %c0_7] : memref<8x128xi32, #tpu.memory_space<vmem>>, vector<8x128xi32>
    tpu.vector_store %arg3[%c0_6, %c0_7], %21 {strides = array<i32>} : memref<8x128xi32, #tpu.memory_space<vmem>>, vector<8x128xi32>,
    return
  }
  func.func @transform_0(%arg0: i32) -> (i32, i32, i32) {
    %c0_i32 = arith.constant 0 : i32
    %c0_i32_0 = arith.constant 0 : i32
    %c0_i32_1 = arith.constant 0 : i32
    return %c0_i32, %arg0, %c0_i32_0 : i32, i32, i32
  }
  func.func @transform_1(%arg0: i32) -> (i32, i32) {
    %c0_i32 = arith.constant 0 : i32
    %c0_i32_0 = arith.constant 0 : i32
    return %arg0, %c0_i32 : i32, i32
  }
  func.func @transform_2(%arg0: i32) -> (i32, i32) {
    %c0_i32 = arith.constant 0 : i32
    %c0_i32_0 = arith.constant 0 : i32
    return %arg0, %c0_i32 : i32, i32
  }
}

</mosaic_0001>

<bundles_post_ra>
// kernel: pool_in_dim.1
= control target key start
LH: loop header
LB: loop body
LE: loop exit
PB: predicated region body
PF: predicated region fallthrough
CT: control target
= control target key end

     0   :  { %v21_v0 = vlaneseq  ;;  %vm39_vm3 = vmmov 1   ;;  %v40_v6 = vmov 0   ;;  %s68_s0 = inlined_call_operand.vmem [shape: f32[2,8,128], index: 0, kind: input, shape index: {}]   ;;  %s69_s1 = inlined_call_operand.vmem [shape: f32[8,128], index: 1, kind: output, shape index: {0}]   ;;  %s70_s2 = inlined_call_operand.vmem [shape: s32[8,128], index: 2, kind: output, shape index: {1}]  }
   0x1   :  { %v10_v1 = vld [vmem:[%s68_s0] sm:$0xff]  ;;  %v36_v2 = vld [vmem:[%s68_s0 + $0x8] sm:$0xff] }
   0x2   :  { %vm13_vm0 = vcmp.gt.f32.partialorder %v36_v2, %v10_v1  ;;  %vm14_vm1 = vcmp.ne.f32.partialorder %v36_v2, %v36_v2  ;;  %vm15_vm2 = vcmp.ne.f32.partialorder %v10_v1, %v10_v1  ;;  %v22_v3 = vand.u32 127, %v21_v0 }
   0x3   :  { %vm16_vm4 = vmxor %vm15_vm2, %vm39_vm3 }
   0x4   :  { %vm17_vm5 = vmand %vm14_vm1, %vm16_vm4  ;;  %v23_v4 = vand.u32 63, %v22_v3 }
   0x5   :  { %vm18_vm6 = vmor %vm13_vm0, %vm17_vm5 }
   0x6   :  { %v19_v5 = vsel %vm18_vm6, %v36_v2, %v10_v1  ;;  %v20_v7 = vsel %vm18_vm6, 1, %v40_v6  ;;  %v25_v8 = vmul.u32 2, %v23_v4 }
   0x7   :  { %24 = vst [vmem:[%s69_s1] sm:$0xff] %v19_v5 }
   0x8   :  { %v26_v9 = vadd.s32 %v25_v8, %v20_v7 }
   0xa   :  { %27 = vst [vmem:[%s70_s2] sm:$0xff] %v26_v9 }

</bundles_post_ra>
